<compile_context>
chip_gen: v5e
topology: v5e:2x2
jax: 0.10.0
libtpu: 0.0.40
codegen_flags: <defaults>
</compile_context>

<pallas_src>
import jax
import jax.numpy as jnp
from jax.experimental import pallas as pl
from jax.experimental.pallas import tpu as pltpu

EPS = 1e-5
MIB = 1024 * 1024


def _round_up(a: int, b: int) -> int:
    return ((a + b - 1) // b) * b


def _vmem_budget_bytes() -> int:
    """Usable scoped-VMEM budget for this kernel, per TensorCore."""
    cap = 64 * MIB  # conservative default = v7x per-TC VMEM
    try:
        info = pltpu.get_tpu_info()
        cap = int(getattr(info, "vmem_capacity_bytes", cap))
    except Exception:
        pass
    # Leave headroom for Mosaic-internal scratch; ~100 MiB cap on 128 MiB parts.
    return max(24 * MIB, min(cap - 12 * MIB, 100 * MIB))


def prenorm_linear_kernel(x_ref, gamma_ref, beta_ref, w_ref, bias_ref, o_ref):
    """One (row-tile x out-col-slab) step: LayerNorm the rows, matmul the slab."""
    # LayerNorm statistics in f32 (PyTorch: biased variance, eps inside rsqrt).
    x = x_ref[...].astype(jnp.float32)
    mean = jnp.mean(x, axis=-1, keepdims=True)
    centered = x - mean
    var = jnp.mean(centered * centered, axis=-1, keepdims=True)
    normed = centered * jax.lax.rsqrt(var + EPS)
    # gamma/beta were pre-cast to f32 in the wrapper (no per-step casts here).
    normed = normed * gamma_ref[...] + beta_ref[...]
    # fn = Linear(dim, dim): MXU matmul in the weight's (narrow) dtype with
    # f32 accumulation; w_ref is the (D_in, tn) slab of W^T, already bf16.
    y = jnp.dot(normed.astype(w_ref.dtype), w_ref[...],
                preferred_element_type=jnp.float32)
    o_ref[...] = (y + bias_ref[...]).astype(o_ref.dtype)


def prenorm_linear(x, gamma, beta, w, bias, *, tm_max=1024, tn_max=512,
                   matmul_dtype=jnp.bfloat16):
    """PreNorm with fn = Linear(dim, dim), fused.

    x: (B, S, D). gamma/beta: (D,). w: (D_out, D_in) PyTorch Linear layout.
    bias: (D_out,).
    """
    B, S, D = x.shape
    D_out, D_in = w.shape
    assert D_in == D, "weight in-dim must match hidden dim"

    N = B * S
    x2 = x.reshape(N, D_in)

    xb = jnp.dtype(x.dtype).itemsize
    ob = xb
    wb = jnp.dtype(matmul_dtype).itemsize

    # Row-tile granularity: 8 sublanes x packing (2 rows/sublane for bf16).
    row_align = 8 * max(1, 4 // xb)
    tm_cap = min(_round_up(max(N, 1), row_align), _round_up(tm_max, row_align))
    tm_floor = min(tm_cap, max(row_align, 256))

    budget = _vmem_budget_bytes()

    def est(tm, tn, w_bufs):
        # Pipelined tiles + (possibly resident) weight + in-kernel f32 temps.
        tiles = 2 * tm * D_in * xb + 2 * tm * tn * ob
        weight = w_bufs * (D_in * tn * wb + 8 * tn * 4)   # W^T slab + bias row
        params = 2 * 8 * D_in * 4                          # gamma + beta rows
        temps = 3 * tm * D_in * 4 + tm * tn * 4 + tm * D_in * wb
        return tiles + weight + params + temps

    # ---- Plan: prefer full weight residency (weight DMA'd exactly once). ----
    plan = None
    tm = tm_cap
    while plan is None:
        if est(tm, D_out, 2) <= budget:
            plan = ("resident", tm, D_out, False)
        elif est(tm, D_out, 1) <= budget:
            plan = ("resident", tm, D_out, True)   # single-buffer the weight
        elif tm > tm_floor:
            tm = max(tm_floor, tm // 2)
        else:
            break

    if plan is None:
        # ---- Weight too large: tile output columns, j OUTER / i INNER so each
        # weight slab is fetched from HBM exactly once. ----
        tm = tm_cap
        tn = max(256, _round_up(min(tn_max, D_out), 256))
        while est(tm, tn, 2) > budget and tm > tm_floor:
            tm = max(tm_floor, tm // 2)
        while est(tm, tn, 2) > budget and tn > 256:
            tn = max(256, tn // 2)
        plan = ("tiled", tm, tn, False)

    mode, tm, tn, single_buffer_w = plan

    # One-time wrapper-side dtype prep: all casts hoisted out of the kernel.
    wt = w.T.astype(matmul_dtype)                      # (D_in, D_out) MXU operand
    gamma2 = gamma.astype(jnp.float32).reshape(1, D_in)
    beta2 = beta.astype(jnp.float32).reshape(1, D_in)
    bias2 = bias.astype(jnp.float32).reshape(1, D_out)

    w_spec_kwargs = {}
    if single_buffer_w:
        # Weight block index is constant across the whole grid in the resident
        # path, so single-buffering costs no overlap and halves its VMEM.
        w_spec_kwargs["pipeline_mode"] = pl.Buffered(1)

    est_bytes = est(tm, D_out if mode == "resident" else tn,
                    1 if single_buffer_w else 2)
    vmem_limit = int(min(budget + 10 * MIB, max(int(est_bytes * 1.3), 32 * MIB)))

    if mode == "resident":
        grid = (pl.cdiv(N, tm),)
        in_specs = [
            pl.BlockSpec((tm, D_in), lambda i: (i, 0)),              # x rows
            pl.BlockSpec((1, D_in), lambda i: (0, 0)),               # gamma
            pl.BlockSpec((1, D_in), lambda i: (0, 0)),               # beta
            pl.BlockSpec((D_in, D_out), lambda i: (0, 0),            # full W^T
                         **w_spec_kwargs),
            pl.BlockSpec((1, D_out), lambda i: (0, 0),               # bias
                         **w_spec_kwargs),
        ]
        out_specs = pl.BlockSpec((tm, D_out), lambda i: (i, 0))
        dim_sem = ("parallel",)
    else:
        grid = (pl.cdiv(D_out, tn), pl.cdiv(N, tm))                  # j outer, i inner
        in_specs = [
            pl.BlockSpec((tm, D_in), lambda j, i: (i, 0)),           # x rows
            pl.BlockSpec((1, D_in), lambda j, i: (0, 0)),            # gamma
            pl.BlockSpec((1, D_in), lambda j, i: (0, 0)),            # beta
            pl.BlockSpec((D_in, tn), lambda j, i: (0, j)),           # W^T slab
            pl.BlockSpec((1, tn), lambda j, i: (0, j)),              # bias slab
        ]
        out_specs = pl.BlockSpec((tm, tn), lambda j, i: (i, j))
        dim_sem = ("arbitrary", "parallel")

    out = pl.pallas_call(
        prenorm_linear_kernel,
        out_shape=jax.ShapeDtypeStruct((N, D_out), x.dtype),
        grid_spec=pltpu.PrefetchScalarGridSpec(
            num_scalar_prefetch=0,
            grid=grid,
            in_specs=in_specs,
            out_specs=out_specs,
        ),
        compiler_params=pltpu.CompilerParams(
            dimension_semantics=dim_sem,
            vmem_limit_bytes=vmem_limit,
        ),
    )(x2, gamma2, beta2, wt, bias2)

    return out.reshape(B, S, D_out)


def prenorm_linear_ref(x, gamma, beta, w, bias):
    xf = x.astype(jnp.float32)
    mean = jnp.mean(xf, axis=-1, keepdims=True)
    var = jnp.mean((xf - mean) ** 2, axis=-1, keepdims=True)
    normed = (xf - mean) * jax.lax.rsqrt(var + EPS) * gamma.astype(jnp.float32) \
        + beta.astype(jnp.float32)
    return normed @ w.T.astype(jnp.float32) + bias.astype(jnp.float32)


if __name__ == "__main__":
    # Small demo shapes: batch=2, seq=8, hidden=128 (lane-dense last dim).
    B, S, D = 2, 8, 128
    key = jax.random.PRNGKey(0)
    kx, kg, kb, kw, kbi = jax.random.split(key, 5)

    # bf16 activations: fused matmul runs on the native bf16 MXU path.
    x = jax.random.normal(kx, (B, S, D), dtype=jnp.float32).astype(jnp.bfloat16)
    # LayerNorm params (PyTorch init weight=1, bias=0; small deterministic perturbation).
    gamma = jnp.ones((D,), jnp.float32) + 0.01 * jax.random.normal(kg, (D,), jnp.float32)
    beta = 0.01 * jax.random.normal(kb, (D,), jnp.float32)
    # fn = Linear(D, D) params, deterministic, (out, in) PyTorch layout.
    w = 0.1 * jax.random.normal(kw, (D, D), dtype=jnp.float32)
    bias = 0.1 * jax.random.normal(kbi, (D,), dtype=jnp.float32)

    out = prenorm_linear(x, gamma, beta, w, bias)
    jax.block_until_ready(out)

    ref = prenorm_linear_ref(x, gamma, beta, w, bias)
    assert out.shape == (B, S, D)
    out_f32 = out.astype(jnp.float32)
    max_err = float(jnp.max(jnp.abs(out_f32 - ref)))
    # bf16 matmul + bf16 output vs f32 reference -> bf16-appropriate tolerance.
    assert jnp.allclose(out_f32, ref, atol=3e-2, rtol=3e-2), \
        f"mismatch vs reference (max abs err {max_err})"

    print("KERNEL_OK")
</pallas_src>

<mosaic_0001>
module attributes {stable_mosaic.version = 11 : i64} {
  func.func @prenorm_linear_kernel(%arg0: i32, %arg1: memref<16x128xbf16, #tpu.memory_space<vmem>>, %arg2: memref<1x128xf32, #tpu.memory_space<vmem>>, %arg3: memref<1x128xf32, #tpu.memory_space<vmem>>, %arg4: memref<128x128xbf16, #tpu.memory_space<vmem>>, %arg5: memref<1x128xf32, #tpu.memory_space<vmem>>, %arg6: memref<16x128xbf16, #tpu.memory_space<vmem>>) attributes {dimension_semantics = [#tpu.dimension_semantics<parallel>], iteration_bounds = array<i64: 1>, scalar_prefetch = 0 : i64, scratch_operands = 0 : i64, tpu.core_type = #tpu.core_type<tc>, window_params = [{transform_indices = @transform_0, window_bounds = array<i64: 16, 128>}, {pipeline_mode = #tpu.pipeline_mode<synchronous>, transform_indices = @transform_1, window_bounds = array<i64: 1, 128>}, {pipeline_mode = #tpu.pipeline_mode<synchronous>, transform_indices = @transform_2, window_bounds = array<i64: 1, 128>}, {pipeline_mode = #tpu.pipeline_mode<synchronous>, transform_indices = @transform_3, window_bounds = array<i64: 128, 128>}, {pipeline_mode = #tpu.pipeline_mode<synchronous>, transform_indices = @transform_4, window_bounds = array<i64: 1, 128>}, {transform_indices = @transform_5, window_bounds = array<i64: 16, 128>}]} {
    %c0 = arith.constant 0 : index
    %c0_0 = arith.constant 0 : index
    %0 = vector.load %arg1[%c0, %c0_0] : memref<16x128xbf16, #tpu.memory_space<vmem>>, vector<16x128xbf16>
    %1 = arith.extf %0 : vector<16x128xbf16> to vector<16x128xf32>
    %cst = arith.constant dense<0.000000e+00> : vector<16xf32>
    %2 = vector.multi_reduction <add>, %1, %cst [1] : vector<16x128xf32> to vector<16xf32>
    %3 = vector.shape_cast %2 : vector<16xf32> to vector<16x1xf32>
    %cst_1 = arith.constant 1.280000e+02 : f32
    %4 = vector.broadcast %cst_1 : f32 to vector<16x1xf32>
    %5 = arith.divf %3, %4 : vector<16x1xf32>
    %6 = vector.broadcast %5 : vector<16x1xf32> to vector<16x128xf32>
    %7 = arith.subf %1, %6 : vector<16x128xf32>
    %8 = arith.mulf %7, %7 : vector<16x128xf32>
    %cst_2 = arith.constant dense<0.000000e+00> : vector<16xf32>
    %9 = vector.multi_reduction <add>, %8, %cst_2 [1] : vector<16x128xf32> to vector<16xf32>
    %10 = vector.shape_cast %9 : vector<16xf32> to vector<16x1xf32>
    %cst_3 = arith.constant 1.280000e+02 : f32
    %11 = vector.broadcast %cst_3 : f32 to vector<16x1xf32>
    %12 = arith.divf %10, %11 : vector<16x1xf32>
    %cst_4 = arith.constant 9.99999974E-6 : f32
    %13 = vector.broadcast %cst_4 : f32 to vector<16x1xf32>
    %14 = arith.addf %12, %13 : vector<16x1xf32>
    %15 = math.rsqrt %14 : vector<16x1xf32>
    %16 = vector.broadcast %15 : vector<16x1xf32> to vector<16x128xf32>
    %17 = arith.mulf %7, %16 : vector<16x128xf32>
    %c0_5 = arith.constant 0 : index
    %c0_6 = arith.constant 0 : index
    %18 = vector.load %arg2[%c0_5, %c0_6] : memref<1x128xf32, #tpu.memory_space<vmem>>, vector<1x128xf32>
    %19 = vector.broadcast %18 : vector<1x128xf32> to vector<16x128xf32>
    %20 = arith.mulf %17, %19 : vector<16x128xf32>
    %c0_7 = arith.constant 0 : index
    %c0_8 = arith.constant 0 : index
    %21 = vector.load %arg3[%c0_7, %c0_8] : memref<1x128xf32, #tpu.memory_space<vmem>>, vector<1x128xf32>
    %22 = vector.broadcast %21 : vector<1x128xf32> to vector<16x128xf32>
    %23 = arith.addf %20, %22 : vector<16x128xf32>
    %24 = arith.truncf %23 : vector<16x128xf32> to vector<16x128xbf16>
    %c0_9 = arith.constant 0 : index
    %c0_10 = arith.constant 0 : index
    %25 = vector.load %arg4[%c0_9, %c0_10] : memref<128x128xbf16, #tpu.memory_space<vmem>>, vector<128x128xbf16>
    %cst_11 = arith.constant dense<0.000000e+00> : vector<16x128xf32>
    %26 = tpu.matmul %24, %25, %cst_11 {dimension_numbers = #tpu.dot_dimension_numbers<[1], [0], [0], [1], [0, 0, 1, 1], [], []>} : vector<16x128xbf16>, vector<128x128xbf16>, vector<16x128xf32> -> vector<16x128xf32>
    %c0_12 = arith.constant 0 : index
    %c0_13 = arith.constant 0 : index
    %27 = vector.load %arg5[%c0_12, %c0_13] : memref<1x128xf32, #tpu.memory_space<vmem>>, vector<1x128xf32>
    %28 = vector.broadcast %27 : vector<1x128xf32> to vector<16x128xf32>
    %29 = arith.addf %26, %28 : vector<16x128xf32>
    %30 = arith.truncf %29 : vector<16x128xf32> to vector<16x128xbf16>
    %c0_14 = arith.constant 0 : index
    %c0_15 = arith.constant 0 : index
    %31 = vector.load %arg6[%c0_14, %c0_15] : memref<16x128xbf16, #tpu.memory_space<vmem>>, vector<16x128xbf16>
    tpu.vector_store %arg6[%c0_14, %c0_15], %30 {strides = array<i32>} : memref<16x128xbf16, #tpu.memory_space<vmem>>, vector<16x128xbf16>,
    return
  }
  func.func @transform_0(%arg0: i32) -> (i32, i32) {
    %c0_i32 = arith.constant 0 : i32
    %c0_i32_0 = arith.constant 0 : i32
    return %arg0, %c0_i32 : i32, i32
  }
  func.func @transform_1(%arg0: i32) -> (i32, i32) {
    %c0_i32 = arith.constant 0 : i32
    %c0_i32_0 = arith.constant 0 : i32
    %c0_i32_1 = arith.constant 0 : i32
    return %c0_i32, %c0_i32_0 : i32, i32
  }
  func.func @transform_2(%arg0: i32) -> (i32, i32) {
    %c0_i32 = arith.constant 0 : i32
    %c0_i32_0 = arith.constant 0 : i32
    %c0_i32_1 = arith.constant 0 : i32
    return %c0_i32, %c0_i32_0 : i32, i32
  }
  func.func @transform_3(%arg0: i32) -> (i32, i32) {
    %c0_i32 = arith.constant 0 : i32
    %c0_i32_0 = arith.constant 0 : i32
    %c0_i32_1 = arith.constant 0 : i32
    return %c0_i32, %c0_i32_0 : i32, i32
  }
  func.func @transform_4(%arg0: i32) -> (i32, i32) {
    %c0_i32 = arith.constant 0 : i32
    %c0_i32_0 = arith.constant 0 : i32
    %c0_i32_1 = arith.constant 0 : i32
    return %c0_i32, %c0_i32_0 : i32, i32
  }
  func.func @transform_5(%arg0: i32) -> (i32, i32) {
    %c0_i32 = arith.constant 0 : i32
    %c0_i32_0 = arith.constant 0 : i32
    return %arg0, %c0_i32 : i32, i32
  }
}

</mosaic_0001>

<bundles_post_ra>
// kernel: tpu_custom_call.1
= control target key start
LH: loop header
LB: loop body
LE: loop exit
PB: predicated region body
PF: predicated region fallthrough
CT: control target
= control target key end

     0   :  { %10 = vsyncpa [#allocation3], 0  ;;  %s467_s0 = inlined_call_operand.hbm [shape: bf16[16,128], index: 0, kind: input, shape index: {}]   ;;  %s468_s1 = inlined_call_operand.hbm [shape: f32[1,128], index: 1, kind: input, shape index: {}]   ;;  %s469_s2 = inlined_call_operand.vmem [shape: f32[1,128], index: 2, kind: input, shape index: {}]   ;;  %s470_s3 = inlined_call_operand.hbm [shape: bf16[128,128], index: 3, kind: input, shape index: {}]   ;;  %s471_s4 = inlined_call_operand.vmem [shape: f32[1,128], index: 4, kind: input, shape index: {}]   ;;  %s472_s5 = inlined_call_operand.hbm [shape: bf16[16,128], index: 5, kind: output, shape index: {}]  }
   0x1   :  { %11 = vsyncpa [#allocation6], 0  ;;  %s31_s20 = sshll.u32 %s468_s1, 4  ;;  %s32_s20 = int_to_ptr.hbm [resolvable:$true] %s31_s20 }
   0x2   :  { %12 = vsyncpa [#allocation4], 0  ;;  %s403_s21 = smov [#allocation5]   ;;  %s17_s25 = sshll.u32 %s467_s0, 4  ;;  %s18_s25 = int_to_ptr.hbm [resolvable:$true] %s17_s25 }
   0x3   :  { %s33_s22 = sshll.u32 %s403_s21, 4  ;;  %s404_s26 = smov [#allocation2]   ;;  %s34_s22 = int_to_ptr.vmem [resolvable:$true] %s33_s22 }
   0x4   :  { %36 = dma.hbm_to_vmem [thread:$0]  %s32_s20, 16, %s34_s22, [#allocation6]  }
   0x5   :  { %s19_s27 = sshll.u32 %s404_s26, 4  ;;  %s405_s28 = smov 64   ;;  %s20_s27 = int_to_ptr.vmem [resolvable:$true] %s19_s27 }
   0x6   :  { %s406_s29 = smov 4   ;;  %s43_s6 = sshll.u32 %s470_s3, 4  ;;  %s44_s6 = int_to_ptr.hbm [resolvable:$true] %s43_s6 }
   0x7   :  { %25 = dma.hbm_to_vmem [thread:$0]  %s18_s25, 128, %s20_s27, [#allocation3], %s405_s28, %s405_s28, %s406_s29  }
   0x8   :  { %s407_s7 = smov [#allocation7]  }
   0x9   :  { %s45_s8 = sshll.u32 %s407_s7, 4  ;;  %s46_s8 = int_to_ptr.vmem [resolvable:$true] %s45_s8 }
   0xa   :  { %51 = dma.hbm_to_vmem [thread:$0]  %s44_s6, 1024, %s46_s8, [#allocation6], %s405_s28, %s405_s28, %s406_s29  }
   0xb   :  { %397 = dma.done.wait [#allocation3], 128  }
   0xc   :  { %398 = vsyncadd [#allocation3], 4294967168 }
   0xd   :  { %399 = dma.done.wait [#allocation6], 1040  }
   0xe   :  { %400 = vsyncadd [#allocation6], 4294966256  ;;  %v277_v0 = vld [vmem:[#allocation2] sm:$0xff]   ;;  %v408_v3 = vmov 128.0   ;;  %v273_v20 = vld [vmem:[#allocation7 + $0x28] sm:$0xff]  ;;  %s409_s11 = smov [#allocation8]  }
   0xf   :  { %v278_v1 = vunpack.c.l.bf16 %v277_v0  ;;  %v279_v2 = vunpack.c.h.bf16 %v277_v0  ;;  %295 = vrcp.f32 %v408_v3  ;;  %v275_v18 = vld [vmem:[#allocation7 + $0x38] sm:$0xff]  ;;  %v274_v19 = vld [vmem:[#allocation7 + $0x30] sm:$0xff]  ;;  %v272_v21 = vld [vmem:[#allocation7 + $0x20] sm:$0xff]  ;;  %s220_s12 = sshll.u32 %s409_s11, 4  ;;  %s222_s15 = sshll.u32 %s472_s5, 4  ;;  %s221_s12 = int_to_ptr.vmem [resolvable:$true] %s220_s12  ;;  %s223_s15 = int_to_ptr.hbm [resolvable:$true] %s222_s15 }
  0x10   :  { %198 = vmatpush.bf16.msra.mxu0 %v275_v18  ;;  %v271_v22 = vld [vmem:[#allocation7 + $0x18] sm:$0xff]  ;;  %v270_v23 = vld [vmem:[#allocation7 + $0x10] sm:$0xff]  ;;  %v269_v24 = vld [vmem:[#allocation7 + $0x8] sm:$0xff] }
  0x11   :  { %70 = vadd.xlane.f32.xlu0 %v278_v1  ;;  %v268_v26 = vld [vmem:[#allocation7] sm:$0xff]  ;;  %v292_v45 = vld [vmem:[#allocation5] ss:$0 sm:$0xff]  ;;  %v293_v50 = vld [vmem:[%s469_s2] ss:$0 sm:$0xff] }
  0x12   :  { %v294_v56 = vld [vmem:[%s471_s4] ss:$0 sm:$0xff] }
  0x14   :  { %199 = vmatpush.bf16.msra.mxu0 %v274_v19 }
  0x15   :  { %v296_v4 = vpop.eup %295 }
  0x16   :  { %v75_v5 = vmul.f32 128.0, %v296_v4  ;;  %vm79_vm0 = vweird.f32 %v296_v4 }
  0x18   :  { %v76_v6 = vsub.f32 1.0, %v75_v5  ;;  %200 = vmatpush.bf16.msra.mxu0 %v273_v20 }
  0x19   :  { %72 = vadd.xlane.f32.xlu0 %v279_v2 }
  0x1a   :  { %v77_v7 = vmul.f32 %v296_v4, %v76_v6 }
  0x1c   :  { %v78_v8 = vadd.f32 %v296_v4, %v77_v7  ;;  %201 = vmatpush.bf16.msra.mxu0 %v272_v21 }
  0x1e   :  { %v80_v9 = vsel %vm79_vm0, %v296_v4, %v78_v8 }
  0x20   :  { %202 = vmatpush.bf16.msra.mxu0 %v271_v22 }
  0x24   :  { %203 = vmatpush.bf16.msra.mxu0 %v270_v23 }
  0x28   :  { %204 = vmatpush.bf16.msra.mxu0 %v269_v24 }
  0x2c   :  { %205 = vmatpush.bf16.msra.mxu0 %v268_v26 }
  0x84   :  { %v71_v10 = vpop.xlane.xlu0 %70 }
  0x85   :  { %v81_v11 = vmul.f32 %v80_v9, %v71_v10 }
  0x87   :  { %v83_v12 = vsub.f32 %v278_v1, %v81_v11 }
  0x89   :  { %v85_v13 = vmul.f32 %v83_v12, %v83_v12 }
  0x8b   :  { %87 = vadd.xlane.f32.xlu1 %v85_v13 }
  0x8c   :  { %v73_v14 = vpop.xlane.xlu0 %72 }
  0x8d   :  { %v82_v15 = vmul.f32 %v80_v9, %v73_v14 }
  0x8f   :  { %v84_v16 = vsub.f32 %v279_v2, %v82_v15 }
  0x91   :  { %v86_v17 = vmul.f32 %v84_v16, %v84_v16 }
  0x93   :  { %89 = vadd.xlane.f32.xlu1 %v86_v17 }
  0xfe   :  { %v88_v25 = vpop.xlane.xlu1 %87 }
  0xff   :  { %v91_v27 = vmul.f32 %v88_v25, %v80_v9 }
 0x101   :  { %v93_v28 = vadd.f32 1e-05, %v91_v27 }
 0x103   :  { %297 = vrsqrt.f32 %v93_v28  ;;  %vm101_vm2 = vweird.f32 %v93_v28 }
 0x106   :  { %v90_v29 = vpop.xlane.xlu1 %89 }
 0x107   :  { %v92_v30 = vmul.f32 %v90_v29, %v80_v9 }
 0x109   :  { %v298_v31 = vpop.eup %297  ;;  %v94_v32 = vadd.f32 1e-05, %v92_v30 }
 0x10a   :  { %v96_v33 = vmul.f32 %v298_v31, %v93_v28  ;;  %vm102_vm1 = vweird.f32 %v298_v31 }
 0x10b   :  { %299 = vrsqrt.f32 %v94_v32  ;;  %vm103_vm3 = vmor %vm101_vm2, %vm102_vm1  ;;  %vm111_vm5 = vweird.f32 %v94_v32 }
 0x10c   :  { %v97_v34 = vmul.f32 %v298_v31, %v96_v33 }
 0x10e   :  { %v98_v35 = vmul.f32 0.5, %v97_v34 }
 0x110   :  { %v99_v36 = vsub.f32 1.5, %v98_v35 }
 0x111   :  { %v300_v37 = vpop.eup %299 }
 0x112   :  { %v100_v38 = vmul.f32 %v298_v31, %v99_v36  ;;  %v106_v39 = vmul.f32 %v300_v37, %v94_v32  ;;  %vm112_vm4 = vweird.f32 %v300_v37 }
 0x113   :  { %vm113_vm6 = vmor %vm111_vm5, %vm112_vm4 }
 0x114   :  { %v107_v40 = vmul.f32 %v300_v37, %v106_v39  ;;  %v104_v42 = vsel %vm103_vm3, %v298_v31, %v100_v38 }
 0x115   :  { %v115_v44 = vmul.f32 %v104_v42, %v83_v12 }
 0x116   :  { %v108_v41 = vmul.f32 0.5, %v107_v40 }
 0x117   :  { %v121_v49 = vmul.f32 %v292_v45, %v115_v44 }
 0x118   :  { %v109_v43 = vsub.f32 1.5, %v108_v41 }
 0x119   :  { %v127_v52 = vadd.f32 %v293_v50, %v121_v49 }
 0x11a   :  { %v110_v46 = vmul.f32 %v300_v37, %v109_v43 }
 0x11c   :  { %v114_v47 = vsel %vm113_vm6, %v300_v37, %v110_v46 }
 0x11d   :  { %v116_v48 = vmul.f32 %v114_v47, %v84_v16 }
 0x11f   :  { %v122_v51 = vmul.f32 %v292_v45, %v116_v48 }
 0x121   :  { %v128_v53 = vadd.f32 %v293_v50, %v122_v51 }
 0x123   :  { %v129_v54 = vpack.c.bf16 %v128_v53, %v127_v52 }
 0x125   :  { %206 = vmatmul.bf16.vlgmr.msra.gmra.mxu0 %v129_v54 }
 0x1a2   :  { %v207_v55 = vpop.f32.mrf.mxu0 }
 0x1a3   :  { %v208_v58 = vadd.f32 %v294_v56, %v207_v55 }
 0x1aa   :  { %v209_v57 = vpop.f32.mrf.mxu0 }
 0x1ab   :  { %v210_v59 = vadd.f32 %v294_v56, %v209_v57 }
 0x1ad   :  { %v283_v60 = vpack.c.bf16 %v210_v59, %v208_v58 }
 0x1af   :  { %284 = vst [vmem:[#allocation8] sm:$0xff] %v283_v60  }
 0x1b0   :  { %228 = dma.vmem_to_hbm [thread:$0]  %s221_s12, 128, %s223_s15, [#allocation4], %s405_s28, %s405_s28, %s406_s29  }
 0x1b1   :  { %401 = dma.done.wait [#allocation4], 128  }
 0x1b2   :  { %402 = vsyncadd [#allocation4], 4294967168 }
 0x1b3   :  { %233 = vsyncpa [#allocation3], 1 }
 0x1b4   :  { %234 = vsyncpa [#allocation6], 1 }
 0x1b5   :  { %235 = vsyncpa [#allocation4], 1 }

</bundles_post_ra>
